<compile_context>
chip_gen: v5e
topology: v5e:2x2
jax: 0.10.0
libtpu: 0.0.40
codegen_flags: <defaults>
</compile_context>

<pallas_src>
import math

import jax
import jax.numpy as jnp
from jax import lax
from jax.experimental import pallas as pl
from jax.experimental.pallas import tpu as pltpu

LOG_2PI = math.log(2.0 * math.pi)
_UNROLL_K_LIMIT = 8                 # static Python unroll up to this many components
_VMEM_BUDGET = 20 * 1024 * 1024     # planned VMEM use (tiles + scratch)
_VMEM_LIMIT = 32 * 1024 * 1024      # requested scoped VMEM limit


def _gmp_kernel(z_ref, mu_ref, scale_ref, c_ref, o_ref, dens_ref):
    """One batch tile of the Gaussian-mixture log-density.

    z_ref     : (TB, L)    packed latents, original I/O dtype
    mu_ref    : (K, L)     per-component means (tiled along lanes)
    scale_ref : (K, L)     -0.5 * exp(-logvar)
    c_ref     : (K, L)     -0.5 * (logvar + log(2*pi)) - log(K)
    o_ref     : (TB, L)    logsumexp over the K mixture components
    dens_ref  : (K, TB, L) f32 VMEM scratch caching per-component densities
    """
    z = z_ref[...].astype(jnp.float32)
    n_gauss = mu_ref.shape[0]

    def density(k):
        diff = z - mu_ref[k, :][None, :]
        return diff * diff * scale_ref[k, :][None, :] + c_ref[k, :][None, :]

    if n_gauss <= _UNROLL_K_LIMIT:
        # Pass 1: compute each density once, cache it, track the running max.
        m = None
        for k in range(n_gauss):
            dens = density(k)
            dens_ref[k] = dens
            m = dens if m is None else jnp.maximum(m, dens)
        # Guard the all-components-underflow case (-inf max) -> -inf, not NaN.
        m_safe = jnp.where(m == -jnp.inf, jnp.float32(0.0), m)
        # Pass 2: only load + subtract + exp (EUP) + add.
        s = None
        for k in range(n_gauss):
            e = jnp.exp(dens_ref[k] - m_safe)
            s = e if s is None else s + e
    else:
        dens0 = density(0)
        dens_ref[0] = dens0

        def p1(k, m):
            dens = density(k)
            dens_ref[k] = dens
            return jnp.maximum(m, dens)

        m = lax.fori_loop(1, n_gauss, p1, dens0, unroll=2)
        m_safe = jnp.where(m == -jnp.inf, jnp.float32(0.0), m)

        def p2(k, s):
            return s + jnp.exp(dens_ref[k] - m_safe)

        s = lax.fori_loop(1, n_gauss, p2, jnp.exp(dens_ref[0] - m_safe), unroll=2)

    o_ref[...] = (m_safe + jnp.log(s)).astype(o_ref.dtype)


def _round_up(x, m):
    return (x + m - 1) // m * m


def gaussian_mixture_prior(z, mu_prior, logvar_prior):
    """z: (B, D); mu_prior, logvar_prior: (D, K) -> (B, D) logsumexp density."""
    B, D = z.shape
    K = mu_prior.shape[1]
    io_dtype = z.dtype
    itemsize = jnp.dtype(io_dtype).itemsize

    # Lane-dense packing: pack P batch rows per vreg row so L = P*D is always a
    # multiple of 128 -> unmasked full-lane stores, every VPU lane does work.
    P = 128 // math.gcd(D, 128)
    L = P * D

    # Sublane alignment for the I/O dtype (f32 -> 8, bf16 -> 16, int8 -> 32).
    sub = 8 * max(1, 4 // itemsize)

    # Per-component constants, precomputed once on tiny (K, D) arrays.
    mu_t = jnp.transpose(mu_prior).astype(jnp.float32)        # (K, D)
    lv_t = jnp.transpose(logvar_prior).astype(jnp.float32)    # (K, D)
    scale_t = -0.5 * jnp.exp(-lv_t)                           # (K, D)
    c_t = -0.5 * (lv_t + LOG_2PI) - math.log(float(K))        # (K, D)
    if P > 1:
        mu_t = jnp.tile(mu_t, (1, P))                         # (K, L)
        scale_t = jnp.tile(scale_t, (1, P))
        c_t = jnp.tile(c_t, (1, P))

    # Batch-tile size from an explicit VMEM budget:
    #   2x double-buffered z tile + 2x out tile + (K, TB, L) f32 density scratch.
    R = _round_up(B, P) // P                                   # packed rows
    per_row_bytes = L * (2 * itemsize + 2 * itemsize + 4 * K)
    TB = max(sub, (_VMEM_BUDGET // per_row_bytes) // sub * sub)
    if R > sub:
        # Keep >= 2 grid steps whenever the batch can be split (v7x: 2 TCs).
        TB = min(TB, _round_up(-(-R // 2), sub))
    else:
        TB = sub
    R_total = _round_up(R, TB)
    B_total = R_total * P

    z_in = z
    if B_total != B:
        z_in = jnp.pad(z_in, ((0, B_total - B), (0, 0)))
    z_packed = z_in.reshape(R_total, L)

    grid = (R_total // TB,)

    cost = pl.CostEstimate(
        flops=int((7 * K + 4) * B_total * D),
        transcendentals=int((K + 1) * B_total * D),
        bytes_accessed=int(2 * B_total * D * itemsize + 3 * K * L * 4),
    )

    out_packed = pl.pallas_call(
        _gmp_kernel,
        out_shape=jax.ShapeDtypeStruct((R_total, L), io_dtype),
        grid_spec=pltpu.PrefetchScalarGridSpec(
            num_scalar_prefetch=0,
            grid=grid,
            in_specs=[
                pl.BlockSpec((TB, L), lambda i: (i, 0)),   # z tiles (pipelined)
                pl.BlockSpec((K, L), lambda i: (0, 0)),    # mu (VMEM resident)
                pl.BlockSpec((K, L), lambda i: (0, 0)),    # scale (resident)
                pl.BlockSpec((K, L), lambda i: (0, 0)),    # c (resident)
            ],
            out_specs=pl.BlockSpec((TB, L), lambda i: (i, 0)),
            scratch_shapes=[pltpu.VMEM((K, TB, L), jnp.float32)],
        ),
        compiler_params=pltpu.CompilerParams(
            dimension_semantics=("parallel",),
            vmem_limit_bytes=_VMEM_LIMIT,
        ),
        cost_estimate=cost,
    )(z_packed, mu_t, scale_t, c_t)

    return out_packed.reshape(B_total, D)[:B]


def gaussian_mixture_prior_ref(z, mu_prior, logvar_prior):
    """Pure-JAX reference matching the PyTorch forward exactly."""
    K = mu_prior.shape[1]
    x = z[:, :, None]                        # (B, D, 1)
    mu = mu_prior[None, ...]                 # (1, D, K)
    lv = logvar_prior[None, ...]             # (1, D, K)
    dens = -0.5 * (lv + LOG_2PI + (x - mu) ** 2 / jnp.exp(lv)) - math.log(float(K))
    return jax.scipy.special.logsumexp(dens, axis=-1)


if __name__ == "__main__":
    latent_dim = 32
    gaussians_number = 4
    batch = 8

    key = jax.random.PRNGKey(0)
    kz, kmu, klv = jax.random.split(key, 3)
    z = jax.random.normal(kz, (batch, latent_dim), dtype=jnp.float32)

    # Case 1: zero-initialized parameters, exactly as in the module's __init__.
    mu0 = jnp.zeros((latent_dim, gaussians_number), dtype=jnp.float32)
    lv0 = jnp.zeros((latent_dim, gaussians_number), dtype=jnp.float32)
    out0 = jax.block_until_ready(gaussian_mixture_prior(z, mu0, lv0))
    ref0 = gaussian_mixture_prior_ref(z, mu0, lv0)
    assert out0.shape == (batch, latent_dim)
    assert jnp.allclose(out0, ref0, atol=1e-5, rtol=1e-5), (
        f"zero-init max abs err = {jnp.max(jnp.abs(out0 - ref0))}"
    )

    # Case 2: non-trivial parameters to exercise the numerics.
    mu1 = 0.5 * jax.random.normal(kmu, (latent_dim, gaussians_number), jnp.float32)
    lv1 = 0.3 * jax.random.normal(klv, (latent_dim, gaussians_number), jnp.float32)
    out1 = jax.block_until_ready(gaussian_mixture_prior(z, mu1, lv1))
    ref1 = gaussian_mixture_prior_ref(z, mu1, lv1)
    assert jnp.allclose(out1, ref1, atol=1e-5, rtol=1e-5), (
        f"random-param max abs err = {jnp.max(jnp.abs(out1 - ref1))}"
    )

    # Case 3: bf16 I/O path (input/output stay bf16; internal math in f32).
    z_bf16 = z.astype(jnp.bfloat16)
    out2 = jax.block_until_ready(gaussian_mixture_prior(z_bf16, mu1, lv1))
    ref2 = gaussian_mixture_prior_ref(z_bf16.astype(jnp.float32), mu1, lv1)
    assert out2.dtype == jnp.bfloat16
    assert jnp.allclose(out2.astype(jnp.float32), ref2, atol=5e-2, rtol=5e-2), (
        f"bf16 max abs err = {jnp.max(jnp.abs(out2.astype(jnp.float32) - ref2))}"
    )

    print("KERNEL_OK")
</pallas_src>

<mosaic_0001>
module attributes {stable_mosaic.version = 11 : i64} {
  func.func @_gmp_kernel(%arg0: i32, %arg1: memref<8x128xf32, #tpu.memory_space<vmem>>, %arg2: memref<4x128xf32, #tpu.memory_space<vmem>>, %arg3: memref<4x128xf32, #tpu.memory_space<vmem>>, %arg4: memref<4x128xf32, #tpu.memory_space<vmem>>, %arg5: memref<8x128xf32, #tpu.memory_space<vmem>>, %arg6: memref<4x8x128xf32, #tpu.memory_space<vmem>>) attributes {dimension_semantics = [#tpu.dimension_semantics<parallel>], iteration_bounds = array<i64: 1>, scalar_prefetch = 0 : i64, scratch_operands = 1 : i64, tpu.core_type = #tpu.core_type<tc>, window_params = [{transform_indices = @transform_0, window_bounds = array<i64: 8, 128>}, {pipeline_mode = #tpu.pipeline_mode<synchronous>, transform_indices = @transform_1, window_bounds = array<i64: 4, 128>}, {pipeline_mode = #tpu.pipeline_mode<synchronous>, transform_indices = @transform_2, window_bounds = array<i64: 4, 128>}, {pipeline_mode = #tpu.pipeline_mode<synchronous>, transform_indices = @transform_3, window_bounds = array<i64: 4, 128>}, {transform_indices = @transform_4, window_bounds = array<i64: 8, 128>}]} {
    %c0 = arith.constant 0 : index
    %c0_0 = arith.constant 0 : index
    %0 = vector.load %arg1[%c0, %c0_0] : memref<8x128xf32, #tpu.memory_space<vmem>>, vector<8x128xf32>
    %c0_1 = arith.constant 0 : index
    %c0_2 = arith.constant 0 : index
    %1 = vector.load %arg2[%c0_1, %c0_2] : memref<4x128xf32, #tpu.memory_space<vmem>>, vector<1x128xf32>
    %2 = vector.shape_cast %1 : vector<1x128xf32> to vector<128xf32>
    %3 = vector.shape_cast %2 : vector<128xf32> to vector<1x128xf32>
    %4 = vector.broadcast %3 : vector<1x128xf32> to vector<8x128xf32>
    %5 = arith.subf %0, %4 : vector<8x128xf32>
    %6 = arith.mulf %5, %5 : vector<8x128xf32>
    %c0_3 = arith.constant 0 : index
    %c0_4 = arith.constant 0 : index
    %7 = vector.load %arg3[%c0_3, %c0_4] : memref<4x128xf32, #tpu.memory_space<vmem>>, vector<1x128xf32>
    %8 = vector.shape_cast %7 : vector<1x128xf32> to vector<128xf32>
    %9 = vector.shape_cast %8 : vector<128xf32> to vector<1x128xf32>
    %10 = vector.broadcast %9 : vector<1x128xf32> to vector<8x128xf32>
    %11 = arith.mulf %6, %10 : vector<8x128xf32>
    %c0_5 = arith.constant 0 : index
    %c0_6 = arith.constant 0 : index
    %12 = vector.load %arg4[%c0_5, %c0_6] : memref<4x128xf32, #tpu.memory_space<vmem>>, vector<1x128xf32>
    %13 = vector.shape_cast %12 : vector<1x128xf32> to vector<128xf32>
    %14 = vector.shape_cast %13 : vector<128xf32> to vector<1x128xf32>
    %15 = vector.broadcast %14 : vector<1x128xf32> to vector<8x128xf32>
    %16 = arith.addf %11, %15 : vector<8x128xf32>
    %c0_7 = arith.constant 0 : index
    %c0_8 = arith.constant 0 : index
    %c0_9 = arith.constant 0 : index
    %17 = vector.load %arg6[%c0_7, %c0_8, %c0_9] : memref<4x8x128xf32, #tpu.memory_space<vmem>>, vector<1x8x128xf32>
    %18 = vector.shape_cast %17 : vector<1x8x128xf32> to vector<8x128xf32>
    %19 = vector.shape_cast %16 : vector<8x128xf32> to vector<1x8x128xf32>
    tpu.vector_store %arg6[%c0_7, %c0_8, %c0_9], %19 {strides = array<i32>} : memref<4x8x128xf32, #tpu.memory_space<vmem>>, vector<1x8x128xf32>,
    %c1 = arith.constant 1 : index
    %c0_10 = arith.constant 0 : index
    %20 = vector.load %arg2[%c1, %c0_10] : memref<4x128xf32, #tpu.memory_space<vmem>>, vector<1x128xf32>
    %21 = vector.shape_cast %20 : vector<1x128xf32> to vector<128xf32>
    %22 = vector.shape_cast %21 : vector<128xf32> to vector<1x128xf32>
    %23 = vector.broadcast %22 : vector<1x128xf32> to vector<8x128xf32>
    %24 = arith.subf %0, %23 : vector<8x128xf32>
    %25 = arith.mulf %24, %24 : vector<8x128xf32>
    %c1_11 = arith.constant 1 : index
    %c0_12 = arith.constant 0 : index
    %26 = vector.load %arg3[%c1_11, %c0_12] : memref<4x128xf32, #tpu.memory_space<vmem>>, vector<1x128xf32>
    %27 = vector.shape_cast %26 : vector<1x128xf32> to vector<128xf32>
    %28 = vector.shape_cast %27 : vector<128xf32> to vector<1x128xf32>
    %29 = vector.broadcast %28 : vector<1x128xf32> to vector<8x128xf32>
    %30 = arith.mulf %25, %29 : vector<8x128xf32>
    %c1_13 = arith.constant 1 : index
    %c0_14 = arith.constant 0 : index
    %31 = vector.load %arg4[%c1_13, %c0_14] : memref<4x128xf32, #tpu.memory_space<vmem>>, vector<1x128xf32>
    %32 = vector.shape_cast %31 : vector<1x128xf32> to vector<128xf32>
    %33 = vector.shape_cast %32 : vector<128xf32> to vector<1x128xf32>
    %34 = vector.broadcast %33 : vector<1x128xf32> to vector<8x128xf32>
    %35 = arith.addf %30, %34 : vector<8x128xf32>
    %c1_15 = arith.constant 1 : index
    %c0_16 = arith.constant 0 : index
    %c0_17 = arith.constant 0 : index
    %36 = vector.load %arg6[%c1_15, %c0_16, %c0_17] : memref<4x8x128xf32, #tpu.memory_space<vmem>>, vector<1x8x128xf32>
    %37 = vector.shape_cast %36 : vector<1x8x128xf32> to vector<8x128xf32>
    %38 = vector.shape_cast %35 : vector<8x128xf32> to vector<1x8x128xf32>
    tpu.vector_store %arg6[%c1_15, %c0_16, %c0_17], %38 {strides = array<i32>} : memref<4x8x128xf32, #tpu.memory_space<vmem>>, vector<1x8x128xf32>,
    %39 = arith.maximumf %16, %35 : vector<8x128xf32>
    %c2 = arith.constant 2 : index
    %c0_18 = arith.constant 0 : index
    %40 = vector.load %arg2[%c2, %c0_18] : memref<4x128xf32, #tpu.memory_space<vmem>>, vector<1x128xf32>
    %41 = vector.shape_cast %40 : vector<1x128xf32> to vector<128xf32>
    %42 = vector.shape_cast %41 : vector<128xf32> to vector<1x128xf32>
    %43 = vector.broadcast %42 : vector<1x128xf32> to vector<8x128xf32>
    %44 = arith.subf %0, %43 : vector<8x128xf32>
    %45 = arith.mulf %44, %44 : vector<8x128xf32>
    %c2_19 = arith.constant 2 : index
    %c0_20 = arith.constant 0 : index
    %46 = vector.load %arg3[%c2_19, %c0_20] : memref<4x128xf32, #tpu.memory_space<vmem>>, vector<1x128xf32>
    %47 = vector.shape_cast %46 : vector<1x128xf32> to vector<128xf32>
    %48 = vector.shape_cast %47 : vector<128xf32> to vector<1x128xf32>
    %49 = vector.broadcast %48 : vector<1x128xf32> to vector<8x128xf32>
    %50 = arith.mulf %45, %49 : vector<8x128xf32>
    %c2_21 = arith.constant 2 : index
    %c0_22 = arith.constant 0 : index
    %51 = vector.load %arg4[%c2_21, %c0_22] : memref<4x128xf32, #tpu.memory_space<vmem>>, vector<1x128xf32>
    %52 = vector.shape_cast %51 : vector<1x128xf32> to vector<128xf32>
    %53 = vector.shape_cast %52 : vector<128xf32> to vector<1x128xf32>
    %54 = vector.broadcast %53 : vector<1x128xf32> to vector<8x128xf32>
    %55 = arith.addf %50, %54 : vector<8x128xf32>
    %c2_23 = arith.constant 2 : index
    %c0_24 = arith.constant 0 : index
    %c0_25 = arith.constant 0 : index
    %56 = vector.load %arg6[%c2_23, %c0_24, %c0_25] : memref<4x8x128xf32, #tpu.memory_space<vmem>>, vector<1x8x128xf32>
    %57 = vector.shape_cast %56 : vector<1x8x128xf32> to vector<8x128xf32>
    %58 = vector.shape_cast %55 : vector<8x128xf32> to vector<1x8x128xf32>
    tpu.vector_store %arg6[%c2_23, %c0_24, %c0_25], %58 {strides = array<i32>} : memref<4x8x128xf32, #tpu.memory_space<vmem>>, vector<1x8x128xf32>,
    %59 = arith.maximumf %39, %55 : vector<8x128xf32>
    %c3 = arith.constant 3 : index
    %c0_26 = arith.constant 0 : index
    %60 = vector.load %arg2[%c3, %c0_26] : memref<4x128xf32, #tpu.memory_space<vmem>>, vector<1x128xf32>
    %61 = vector.shape_cast %60 : vector<1x128xf32> to vector<128xf32>
    %62 = vector.shape_cast %61 : vector<128xf32> to vector<1x128xf32>
    %63 = vector.broadcast %62 : vector<1x128xf32> to vector<8x128xf32>
    %64 = arith.subf %0, %63 : vector<8x128xf32>
    %65 = arith.mulf %64, %64 : vector<8x128xf32>
    %c3_27 = arith.constant 3 : index
    %c0_28 = arith.constant 0 : index
    %66 = vector.load %arg3[%c3_27, %c0_28] : memref<4x128xf32, #tpu.memory_space<vmem>>, vector<1x128xf32>
    %67 = vector.shape_cast %66 : vector<1x128xf32> to vector<128xf32>
    %68 = vector.shape_cast %67 : vector<128xf32> to vector<1x128xf32>
    %69 = vector.broadcast %68 : vector<1x128xf32> to vector<8x128xf32>
    %70 = arith.mulf %65, %69 : vector<8x128xf32>
    %c3_29 = arith.constant 3 : index
    %c0_30 = arith.constant 0 : index
    %71 = vector.load %arg4[%c3_29, %c0_30] : memref<4x128xf32, #tpu.memory_space<vmem>>, vector<1x128xf32>
    %72 = vector.shape_cast %71 : vector<1x128xf32> to vector<128xf32>
    %73 = vector.shape_cast %72 : vector<128xf32> to vector<1x128xf32>
    %74 = vector.broadcast %73 : vector<1x128xf32> to vector<8x128xf32>
    %75 = arith.addf %70, %74 : vector<8x128xf32>
    %c3_31 = arith.constant 3 : index
    %c0_32 = arith.constant 0 : index
    %c0_33 = arith.constant 0 : index
    %76 = vector.load %arg6[%c3_31, %c0_32, %c0_33] : memref<4x8x128xf32, #tpu.memory_space<vmem>>, vector<1x8x128xf32>
    %77 = vector.shape_cast %76 : vector<1x8x128xf32> to vector<8x128xf32>
    %78 = vector.shape_cast %75 : vector<8x128xf32> to vector<1x8x128xf32>
    tpu.vector_store %arg6[%c3_31, %c0_32, %c0_33], %78 {strides = array<i32>} : memref<4x8x128xf32, #tpu.memory_space<vmem>>, vector<1x8x128xf32>,
    %79 = arith.maximumf %59, %75 : vector<8x128xf32>
    %cst = arith.constant 0xFF800000 : f32
    %80 = vector.broadcast %cst : f32 to vector<8x128xf32>
    %81 = arith.cmpf oeq, %79, %80 : vector<8x128xf32>
    %cst_34 = arith.constant 0.000000e+00 : f32
    %82 = vector.broadcast %cst_34 : f32 to vector<8x128xf32>
    %83 = arith.select %81, %82, %79 : vector<8x128xi1>, vector<8x128xf32>
    %c0_35 = arith.constant 0 : index
    %c0_36 = arith.constant 0 : index
    %c0_37 = arith.constant 0 : index
    %84 = vector.load %arg6[%c0_35, %c0_36, %c0_37] : memref<4x8x128xf32, #tpu.memory_space<vmem>>, vector<1x8x128xf32>
    %85 = vector.shape_cast %84 : vector<1x8x128xf32> to vector<8x128xf32>
    %86 = arith.subf %85, %83 : vector<8x128xf32>
    %87 = math.exp %86 : vector<8x128xf32>
    %c1_38 = arith.constant 1 : index
    %c0_39 = arith.constant 0 : index
    %c0_40 = arith.constant 0 : index
    %88 = vector.load %arg6[%c1_38, %c0_39, %c0_40] : memref<4x8x128xf32, #tpu.memory_space<vmem>>, vector<1x8x128xf32>
    %89 = vector.shape_cast %88 : vector<1x8x128xf32> to vector<8x128xf32>
    %90 = arith.subf %89, %83 : vector<8x128xf32>
    %91 = math.exp %90 : vector<8x128xf32>
    %92 = arith.addf %87, %91 : vector<8x128xf32>
    %c2_41 = arith.constant 2 : index
    %c0_42 = arith.constant 0 : index
    %c0_43 = arith.constant 0 : index
    %93 = vector.load %arg6[%c2_41, %c0_42, %c0_43] : memref<4x8x128xf32, #tpu.memory_space<vmem>>, vector<1x8x128xf32>
    %94 = vector.shape_cast %93 : vector<1x8x128xf32> to vector<8x128xf32>
    %95 = arith.subf %94, %83 : vector<8x128xf32>
    %96 = math.exp %95 : vector<8x128xf32>
    %97 = arith.addf %92, %96 : vector<8x128xf32>
    %c3_44 = arith.constant 3 : index
    %c0_45 = arith.constant 0 : index
    %c0_46 = arith.constant 0 : index
    %98 = vector.load %arg6[%c3_44, %c0_45, %c0_46] : memref<4x8x128xf32, #tpu.memory_space<vmem>>, vector<1x8x128xf32>
    %99 = vector.shape_cast %98 : vector<1x8x128xf32> to vector<8x128xf32>
    %100 = arith.subf %99, %83 : vector<8x128xf32>
    %101 = math.exp %100 : vector<8x128xf32>
    %102 = arith.addf %97, %101 : vector<8x128xf32>
    %103 = math.log %102 : vector<8x128xf32>
    %104 = arith.addf %83, %103 : vector<8x128xf32>
    %c0_47 = arith.constant 0 : index
    %c0_48 = arith.constant 0 : index
    %105 = vector.load %arg5[%c0_47, %c0_48] : memref<8x128xf32, #tpu.memory_space<vmem>>, vector<8x128xf32>
    tpu.vector_store %arg5[%c0_47, %c0_48], %104 {strides = array<i32>} : memref<8x128xf32, #tpu.memory_space<vmem>>, vector<8x128xf32>,
    return
  }
  func.func @transform_0(%arg0: i32) -> (i32, i32) {
    %c0_i32 = arith.constant 0 : i32
    %c0_i32_0 = arith.constant 0 : i32
    return %arg0, %c0_i32 : i32, i32
  }
  func.func @transform_1(%arg0: i32) -> (i32, i32) {
    %c0_i32 = arith.constant 0 : i32
    %c0_i32_0 = arith.constant 0 : i32
    %c0_i32_1 = arith.constant 0 : i32
    return %c0_i32, %c0_i32_0 : i32, i32
  }
  func.func @transform_2(%arg0: i32) -> (i32, i32) {
    %c0_i32 = arith.constant 0 : i32
    %c0_i32_0 = arith.constant 0 : i32
    %c0_i32_1 = arith.constant 0 : i32
    return %c0_i32, %c0_i32_0 : i32, i32
  }
  func.func @transform_3(%arg0: i32) -> (i32, i32) {
    %c0_i32 = arith.constant 0 : i32
    %c0_i32_0 = arith.constant 0 : i32
    %c0_i32_1 = arith.constant 0 : i32
    return %c0_i32, %c0_i32_0 : i32, i32
  }
  func.func @transform_4(%arg0: i32) -> (i32, i32) {
    %c0_i32 = arith.constant 0 : i32
    %c0_i32_0 = arith.constant 0 : i32
    return %arg0, %c0_i32 : i32, i32
  }
}

</mosaic_0001>

<bundles_post_ra>
// kernel: tpu_custom_call.1
= control target key start
LH: loop header
LB: loop body
LE: loop exit
PB: predicated region body
PF: predicated region fallthrough
CT: control target
= control target key end

     0   :  { %9 = vsyncpa [#allocation4], 0  ;;  %s368_s0 = inlined_call_operand.hbm [shape: f32[8,128], index: 0, kind: input, shape index: {}]   ;;  %s369_s1 = inlined_call_operand.hbm [shape: f32[4,128], index: 1, kind: input, shape index: {}]   ;;  %s370_s2 = inlined_call_operand.hbm [shape: f32[4,128], index: 2, kind: input, shape index: {}]   ;;  %s371_s3 = inlined_call_operand.hbm [shape: f32[4,128], index: 3, kind: input, shape index: {}]   ;;  %s372_s4 = inlined_call_operand.hbm [shape: f32[8,128], index: 4, kind: output, shape index: {}]  }
   0x1   :  { %10 = vsyncpa [#allocation7], 0 }
   0x2   :  { %11 = vsyncpa [#allocation10], 0  ;;  %s29_s17 = sshll.u32 %s369_s1, 4  ;;  %s30_s17 = int_to_ptr.hbm [resolvable:$true] %s29_s17 }
   0x3   :  { %12 = vsyncpa [#allocation5], 0  ;;  %s323_s18 = smov [#allocation6]   ;;  %s18_s22 = sshll.u32 %s368_s0, 4  ;;  %s19_s22 = int_to_ptr.hbm [resolvable:$true] %s18_s22 }
   0x4   :  { %s31_s19 = sshll.u32 %s323_s18, 4  ;;  %s324_s23 = smov [#allocation3]   ;;  %s32_s19 = int_to_ptr.vmem [resolvable:$true] %s31_s19 }
   0x5   :  { %34 = dma.hbm_to_vmem [thread:$0]  %s30_s17, 64, %s32_s19, [#allocation7]  }
   0x6   :  { %s20_s24 = sshll.u32 %s324_s23, 4  ;;  %s40_s27 = sshll.u32 %s370_s2, 4  ;;  %s21_s24 = int_to_ptr.vmem [resolvable:$true] %s20_s24  ;;  %s41_s27 = int_to_ptr.hbm [resolvable:$true] %s40_s27 }
   0x7   :  { %23 = dma.hbm_to_vmem [thread:$0]  %s19_s22, 128, %s21_s24, [#allocation4]  }
   0x8   :  { %s51_s29 = sshll.u32 %s371_s3, 4  ;;  %s325_s30 = smov [#allocation8]   ;;  %s52_s29 = int_to_ptr.hbm [resolvable:$true] %s51_s29 }
   0x9   :  { %s42_s5 = sshll.u32 %s325_s30, 4  ;;  %s326_s0 = smov [#allocation9]   ;;  %s43_s5 = int_to_ptr.vmem [resolvable:$true] %s42_s5 }
   0xa   :  { %45 = dma.hbm_to_vmem [thread:$0]  %s41_s27, 64, %s43_s5, [#allocation7]  }
   0xb   :  { %s53_s6 = sshll.u32 %s326_s0, 4  ;;  %s54_s6 = int_to_ptr.vmem [resolvable:$true] %s53_s6 }
   0xc   :  { %56 = dma.hbm_to_vmem [thread:$0]  %s52_s29, 64, %s54_s6, [#allocation10]  }
   0xd   :  { %315 = dma.done.wait [#allocation4], 128  }
   0xe   :  { %316 = vsyncadd [#allocation4], 4294967168 }
   0xf   :  { %317 = dma.done.wait [#allocation7], 128  }
  0x10   :  { %318 = vsyncadd [#allocation7], 4294967168 }
  0x11   :  { %319 = dma.done.wait [#allocation10], 64  }
  0x12   :  { %320 = vsyncadd [#allocation10], 4294967232  ;;  %v73_v0 = vld [vmem:[#allocation3] sm:$0xff]  ;;  %v173_v1 = vld [vmem:[#allocation6] ss:$0 sm:$0xff]  ;;  %s327_s2 = smov [#allocation11]  }
  0x13   :  { %v76_v2 = vsub.f32 %v73_v0, %v173_v1  ;;  %v174_v3 = vld [vmem:[#allocation8] ss:$0 sm:$0xff]  ;;  %v176_v4 = vld [vmem:[#allocation6 + $0x1] ss:$0 sm:$0xff]  ;;  %v175_v5 = vld [vmem:[#allocation9] ss:$0 sm:$0xff] }
  0x14   :  { %v87_v7 = vsub.f32 %v73_v0, %v176_v4  ;;  %v177_v8 = vld [vmem:[#allocation8 + $0x1] ss:$0 sm:$0xff]  ;;  %v179_v9 = vld [vmem:[#allocation6 + $0x2] ss:$0 sm:$0xff]  ;;  %v178_v10 = vld [vmem:[#allocation9 + $0x1] ss:$0 sm:$0xff] }
  0x15   :  { %v77_v6 = vmul.f32 %v76_v2, %v76_v2  ;;  %v100_v13 = vsub.f32 %v73_v0, %v179_v9  ;;  %v180_v14 = vld [vmem:[#allocation8 + $0x2] ss:$0 sm:$0xff]  ;;  %v182_v15 = vld [vmem:[#allocation6 + $0x3] ss:$0 sm:$0xff]  ;;  %v181_v19 = vld [vmem:[#allocation9 + $0x2] ss:$0 sm:$0xff] }
  0x16   :  { %v88_v12 = vmul.f32 %v87_v7, %v87_v7  ;;  %v113_v20 = vsub.f32 %v73_v0, %v182_v15  ;;  %v183_v21 = vld [vmem:[#allocation8 + $0x3] ss:$0 sm:$0xff]  ;;  %v184_v25 = vld [vmem:[#allocation9 + $0x3] ss:$0 sm:$0xff]  ;;  %s154_s3 = sshll.u32 %s327_s2, 4  ;;  %s156_s9 = sshll.u32 %s372_s4, 4  ;;  %s155_s3 = int_to_ptr.vmem [resolvable:$true] %s154_s3  ;;  %s157_s9 = int_to_ptr.hbm [resolvable:$true] %s156_s9 }
  0x17   :  { %v80_v11 = vmul.f32 %v174_v3, %v77_v6  ;;  %v101_v18 = vmul.f32 %v100_v13, %v100_v13 }
  0x18   :  { %v91_v17 = vmul.f32 %v177_v8, %v88_v12  ;;  %v114_v24 = vmul.f32 %v113_v20, %v113_v20 }
  0x19   :  { %v83_v16 = vadd.f32 %v175_v5, %v80_v11  ;;  %v104_v23 = vmul.f32 %v180_v14, %v101_v18 }
  0x1a   :  { %v94_v22 = vadd.f32 %v178_v10, %v91_v17  ;;  %v117_v28 = vmul.f32 %v183_v21, %v114_v24 }
  0x1b   :  { %v107_v27 = vadd.f32 %v181_v19, %v104_v23 }
  0x1c   :  { %v97_v26 = vmax.f32 %v83_v16, %v94_v22  ;;  %v120_v30 = vadd.f32 %v184_v25, %v117_v28 }
  0x1e   :  { %v110_v29 = vmax.f32 %v97_v26, %v107_v27 }
  0x20   :  { %v123_v31 = vmax.f32 %v110_v29, %v120_v30 }
  0x22   :  { %vm124_vm0 = vcmp.eq.f32.partialorder %v123_v31, -inf }
  0x23   :  { %v125_v32 = vsel %vm124_vm0, 0.0, %v123_v31 }
  0x24   :  { %v127_v33 = vsub.f32 %v83_v16, %v125_v32  ;;  %v131_v34 = vsub.f32 %v94_v22, %v125_v32  ;;  %v136_v35 = vsub.f32 %v107_v27, %v125_v32  ;;  %v141_v36 = vsub.f32 %v120_v30, %v125_v32 }
  0x26   :  { %v128_v37 = vmul.f32 1.442695, %v127_v33  ;;  %v132_v38 = vmul.f32 1.442695, %v131_v34  ;;  %v137_v39 = vmul.f32 1.442695, %v136_v35 }
  0x27   :  { %v142_v40 = vmul.f32 1.442695, %v141_v36 }
  0x28   :  { %185 = vpow2.f32 %v128_v37 }
  0x29   :  { %187 = vpow2.f32 %v132_v38 }
  0x2a   :  { %189 = vpow2.f32 %v137_v39 }
  0x2b   :  { %191 = vpow2.f32 %v142_v40 }
  0x2e   :  { %v186_v41 = vpop.eup %185 }
  0x2f   :  { %v188_v42 = vpop.eup %187 }
  0x30   :  { %v190_v43 = vpop.eup %189  ;;  %v134_v44 = vadd.f32 %v188_v42, %v186_v41 }
  0x31   :  { %v192_v45 = vpop.eup %191 }
  0x32   :  { %v139_v46 = vadd.f32 %v190_v43, %v134_v44 }
  0x34   :  { %v144_v47 = vadd.f32 %v192_v45, %v139_v46 }
  0x36   :  { %193 = vlog2.f32 %v144_v47 }
  0x3c   :  { %v194_v48 = vpop.eup %193 }
  0x3d   :  { %v146_v49 = vmul.f32 0.6931472, %v194_v48 }
  0x3f   :  { %v147_v50 = vadd.f32 %v146_v49, %v125_v32 }
  0x41   :  { %148 = vst [vmem:[#allocation11] sm:$0xff] %v147_v50 }
  0x42   :  { %159 = dma.vmem_to_hbm [thread:$0]  %s155_s3, 128, %s157_s9, [#allocation5]  }
  0x43   :  { %321 = dma.done.wait [#allocation5], 128  }
  0x44   :  { %322 = vsyncadd [#allocation5], 4294967168 }
  0x45   :  { %164 = vsyncpa [#allocation4], 1 }
  0x46   :  { %165 = vsyncpa [#allocation7], 1 }
  0x47   :  { %166 = vsyncpa [#allocation10], 1 }
  0x48   :  { %167 = vsyncpa [#allocation5], 1 }

</bundles_post_ra>
